<compile_context>
chip_gen: v5e
topology: v5e:2x2
jax: 0.10.0
libtpu: 0.0.40
codegen_flags: <defaults>
</compile_context>

<pallas_src>
import functools

import jax
import jax.numpy as jnp
from jax import lax
from jax.experimental import pallas as pl
from jax.experimental.pallas import tpu as pltpu


def _focal_kernel(x_ref, t_ref, *rest, gamma, L, has_alpha):
    """Body for one (image n, lane-tile j) grid point.

    x_ref : (1, C, tl)  logits (native dtype; cast to f32 here)
    t_ref : (1, 1, tl)  int32 target class ids
    at_ref: (1, 1, tl)  f32 alpha[target]                (only if has_alpha)
    o_ref : (1, 1, 1)   f32 per-image partial loss sum
    acc   : (1, 1, tl)  f32 lane-dense running partial sums (VMEM scratch)
    """
    if has_alpha:
        at_ref, o_ref, acc_ref = rest
    else:
        o_ref, acc_ref = rest

    j = pl.program_id(1)

    @pl.when(j == 0)
    def _():
        acc_ref[...] = jnp.zeros_like(acc_ref)

    x = x_ref[...].astype(jnp.float32)                       # (1, C, tl)
    _, C, tl = x.shape

    # log-softmax over the class axis (axis=1, sublanes).
    m = jnp.max(x, axis=1, keepdims=True)                    # (1, 1, tl)
    z = x - m                                                # (1, C, tl)
    lse = jnp.log(jnp.sum(jnp.exp(z), axis=1, keepdims=True))  # (1, 1, tl)

    # One-hot gather of z at the target class; subtract lse afterwards so
    # we never materialize a full (1, C, tl) log-prob array.
    tgt = t_ref[...]                                         # (1, 1, tl)
    cls = lax.broadcasted_iota(jnp.int32, (1, C, tl), 1)
    z_t = jnp.sum(jnp.where(cls == tgt, z, 0.0), axis=1, keepdims=True)
    logpt = z_t - lse                                        # (1, 1, tl)
    pt = jnp.exp(logpt)

    if has_alpha:
        logpt = logpt * at_ref[...]                          # alpha[target]

    # Static specialization of the focal weight (gamma is a Python float).
    g = float(gamma)
    if g == 0.0:
        loss = -logpt
    else:
        one_m_pt = 1.0 - pt
        if g.is_integer() and 1.0 <= g <= 8.0:
            w = one_m_pt
            for _ in range(int(g) - 1):                      # repeated mul, no pow
                w = w * one_m_pt
        else:
            w = one_m_pt ** g
        loss = -w * logpt

    # Mask lanes past the end of the flattened spatial axis (partial tile).
    if L % tl != 0:
        lane = lax.broadcasted_iota(jnp.int32, loss.shape, 2)
        loss = jnp.where(j * tl + lane < L, loss, 0.0)

    # Pure VPU vector accumulation; single reduction only on the last step.
    acc_ref[...] += loss

    @pl.when(j == pl.num_programs(1) - 1)
    def _():
        o_ref[...] = jnp.sum(acc_ref[...]).reshape(o_ref.shape)


def focal_loss(x, target, *, gamma=0.0, alpha=None, size_average=True,
               target_tile_bytes=8 << 20):
    """Pallas implementation of FocalLoss.forward.

    x: (N, C, H, W)/(N, C, ...) or (M, C) logits; target: integer class ids
    whose flattened order matches PyTorch's view(-1).
    """
    x = jnp.asarray(x)
    if x.ndim > 2:
        N, C = x.shape[0], x.shape[1]
        x3 = x.reshape(N, C, -1)          # free reshape, no HBM transpose copy
    else:
        # (M, C) classification input: one small transpose (no NCHW fast path).
        M_, C = x.shape
        x3 = x.T.reshape(1, C, M_)
        N = 1
    N, C, L = x3.shape

    t = jnp.asarray(target).reshape(N, 1, L).astype(jnp.int32)

    # Tile the flattened spatial axis on lanes; aim for a few-MiB logits tile.
    if L <= 128:
        tl = L
    else:
        tl = max(128, min(L, target_tile_bytes // max(1, C * x3.dtype.itemsize)))
        tl = (tl // 128) * 128
    grid_j = pl.cdiv(L, tl)

    has_alpha = alpha is not None
    inputs = [x3, t]
    in_specs = [
        pl.BlockSpec((1, C, tl), lambda n, j: (n, 0, j)),    # logits
        pl.BlockSpec((1, 1, tl), lambda n, j: (n, 0, j)),    # targets
    ]
    if has_alpha:
        if isinstance(alpha, (float, int)) and not isinstance(alpha, bool):
            # Mirrors the PyTorch module: scalar alpha -> [alpha, 1 - alpha].
            a = jnp.asarray([alpha, 1.0 - alpha], jnp.float32)
        else:
            a = jnp.asarray(alpha, jnp.float32).reshape(-1)
        at = jnp.take(a, t).astype(jnp.float32)              # alpha[target], (N,1,L)
        inputs.append(at)
        in_specs.append(pl.BlockSpec((1, 1, tl), lambda n, j: (n, 0, j)))

    kernel = functools.partial(_focal_kernel, gamma=float(gamma), L=L,
                               has_alpha=has_alpha)

    partials = pl.pallas_call(
        kernel,
        out_shape=jax.ShapeDtypeStruct((N, 1, 1), jnp.float32),
        grid_spec=pltpu.PrefetchScalarGridSpec(
            num_scalar_prefetch=0,
            grid=(N, grid_j),
            in_specs=in_specs,
            out_specs=pl.BlockSpec((1, 1, 1), lambda n, j: (n, 0, 0)),
            scratch_shapes=[pltpu.VMEM((1, 1, tl), jnp.float32)],
        ),
        compiler_params=pltpu.CompilerParams(
            dimension_semantics=("parallel", "arbitrary"),
            vmem_limit_bytes=48 * 1024 * 1024,   # safe on v7x (64 MiB physical)
        ),
    )(*inputs)

    total = jnp.sum(partials)
    if size_average:
        return total / jnp.float32(N * L)
    return total


def _focal_loss_ref(x, target, *, gamma=0.0, alpha=None, size_average=True):
    # Pure-JAX reference mirroring the PyTorch forward, for sanity check.
    x = jnp.asarray(x)
    if x.ndim > 2:
        N, C = x.shape[0], x.shape[1]
        x = x.reshape(N, C, -1).transpose(0, 2, 1).reshape(-1, C)
    t = jnp.asarray(target).reshape(-1).astype(jnp.int32)
    logp = jax.nn.log_softmax(x.astype(jnp.float32), axis=1)
    logpt = jnp.take_along_axis(logp, t[:, None], axis=1)[:, 0]
    pt = jnp.exp(logpt)
    if alpha is not None:
        if isinstance(alpha, (float, int)) and not isinstance(alpha, bool):
            a = jnp.asarray([alpha, 1.0 - alpha], jnp.float32)
        else:
            a = jnp.asarray(alpha, jnp.float32).reshape(-1)
        logpt = logpt * a[t]
    loss = -1.0 * (1.0 - pt) ** gamma * logpt
    return jnp.mean(loss) if size_average else jnp.sum(loss)


if __name__ == "__main__":
    key = jax.random.PRNGKey(0)
    k1, k2 = jax.random.split(key)

    # Small deterministic inputs: logits (N, C, H, W), integer targets (N, H, W)
    N, C, H, W = 2, 4, 16, 16
    x = jax.random.normal(k1, (N, C, H, W), dtype=jnp.float32)
    target = jax.random.randint(k2, (N, H, W), 0, C, dtype=jnp.int32)

    # Case 1: gamma=2, per-class alpha, mean reduction.
    gamma = 2.0
    alpha = [0.1, 0.2, 0.3, 0.4]
    loss = focal_loss(x, target, gamma=gamma, alpha=alpha, size_average=True)
    loss = jax.block_until_ready(loss)
    ref = _focal_loss_ref(x, target, gamma=gamma, alpha=alpha, size_average=True)
    assert jnp.allclose(loss, ref, rtol=1e-5, atol=1e-6), (loss, ref)

    # Case 2: gamma=0, no alpha, sum reduction (exercises the other branches).
    loss2 = focal_loss(x, target, gamma=0.0, alpha=None, size_average=False)
    loss2 = jax.block_until_ready(loss2)
    ref2 = _focal_loss_ref(x, target, gamma=0.0, alpha=None, size_average=False)
    assert jnp.allclose(loss2, ref2, rtol=1e-5, atol=1e-5), (loss2, ref2)

    print("KERNEL_OK")
</pallas_src>

<mosaic_0001>
module attributes {stable_mosaic.version = 11 : i64} {
  func.func @_focal_kernel(%arg0: i32, %arg1: i32, %arg2: memref<1x4x256xf32, #tpu.memory_space<vmem>>, %arg3: memref<1x1x256xi32, #tpu.memory_space<vmem>>, %arg4: memref<1x1x256xf32, #tpu.memory_space<vmem>>, %arg5: memref<1x1x1xf32, #tpu.memory_space<vmem>>, %arg6: memref<1x1x256xf32, #tpu.memory_space<vmem>>) attributes {dimension_semantics = [#tpu.dimension_semantics<parallel>, #tpu.dimension_semantics<arbitrary>], iteration_bounds = array<i64: 2, 1>, scalar_prefetch = 0 : i64, scratch_operands = 1 : i64, tpu.core_type = #tpu.core_type<tc>, window_params = [{transform_indices = @transform_0, window_bounds = array<i64: 1, 4, 256>}, {transform_indices = @transform_1, window_bounds = array<i64: 1, 1, 256>}, {transform_indices = @transform_2, window_bounds = array<i64: 1, 1, 256>}, {transform_indices = @transform_3, window_bounds = array<i64: 1, 1, 1>}]} {
    %c0_i32 = arith.constant 0 : i32
    %0 = arith.cmpi eq, %arg1, %c0_i32 : i32
    %1 = arith.extui %0 : i1 to i32
    %c0_i32_0 = arith.constant 0 : i32
    %2 = arith.cmpi ne, %1, %c0_i32_0 : i32
    scf.if %2 {
      %cst_22 = arith.constant 0.000000e+00 : f32
      %36 = vector.broadcast %cst_22 : f32 to vector<1x1x256xf32>
      %c0_23 = arith.constant 0 : index
      %c0_24 = arith.constant 0 : index
      %c0_25 = arith.constant 0 : index
      %37 = vector.load %arg6[%c0_23, %c0_24, %c0_25] : memref<1x1x256xf32, #tpu.memory_space<vmem>>, vector<1x1x256xf32>
      tpu.vector_store %arg6[%c0_23, %c0_24, %c0_25], %36 {strides = array<i32>} : memref<1x1x256xf32, #tpu.memory_space<vmem>>, vector<1x1x256xf32>,
    } else {
    }
    %c0 = arith.constant 0 : index
    %c0_1 = arith.constant 0 : index
    %c0_2 = arith.constant 0 : index
    %3 = vector.load %arg2[%c0, %c0_1, %c0_2] : memref<1x4x256xf32, #tpu.memory_space<vmem>>, vector<1x4x256xf32>
    %cst = arith.constant dense<0xFF800000> : vector<1x256xf32>
    %4 = vector.multi_reduction <maximumf>, %3, %cst [1] : vector<1x4x256xf32> to vector<1x256xf32>
    %5 = vector.shape_cast %4 : vector<1x256xf32> to vector<1x1x256xf32>
    %6 = vector.broadcast %5 : vector<1x1x256xf32> to vector<1x4x256xf32>
    %7 = arith.subf %3, %6 : vector<1x4x256xf32>
    %8 = math.exp %7 : vector<1x4x256xf32>
    %cst_3 = arith.constant dense<0.000000e+00> : vector<1x256xf32>
    %9 = vector.multi_reduction <add>, %8, %cst_3 [1] : vector<1x4x256xf32> to vector<1x256xf32>
    %10 = vector.shape_cast %9 : vector<1x256xf32> to vector<1x1x256xf32>
    %11 = math.log %10 : vector<1x1x256xf32>
    %c0_4 = arith.constant 0 : index
    %c0_5 = arith.constant 0 : index
    %c0_6 = arith.constant 0 : index
    %12 = vector.load %arg3[%c0_4, %c0_5, %c0_6] : memref<1x1x256xi32, #tpu.memory_space<vmem>>, vector<1x1x256xi32>
    %13 = tpu.iota {dimensions = array<i32: 1>} : vector<1x4x256xi32>
    %14 = vector.broadcast %12 : vector<1x1x256xi32> to vector<1x4x256xi32>
    %15 = arith.cmpi eq, %13, %14 : vector<1x4x256xi32>
    %cst_7 = arith.constant 0.000000e+00 : f32
    %16 = vector.broadcast %cst_7 : f32 to vector<1x4x256xf32>
    %17 = arith.select %15, %7, %16 : vector<1x4x256xi1>, vector<1x4x256xf32>
    %cst_8 = arith.constant dense<0.000000e+00> : vector<1x256xf32>
    %18 = vector.multi_reduction <add>, %17, %cst_8 [1] : vector<1x4x256xf32> to vector<1x256xf32>
    %19 = vector.shape_cast %18 : vector<1x256xf32> to vector<1x1x256xf32>
    %20 = arith.subf %19, %11 : vector<1x1x256xf32>
    %21 = math.exp %20 : vector<1x1x256xf32>
    %c0_9 = arith.constant 0 : index
    %c0_10 = arith.constant 0 : index
    %c0_11 = arith.constant 0 : index
    %22 = vector.load %arg4[%c0_9, %c0_10, %c0_11] : memref<1x1x256xf32, #tpu.memory_space<vmem>>, vector<1x1x256xf32>
    %23 = arith.mulf %20, %22 : vector<1x1x256xf32>
    %cst_12 = arith.constant 1.000000e+00 : f32
    %24 = vector.broadcast %cst_12 : f32 to vector<1x1x256xf32>
    %25 = arith.subf %24, %21 : vector<1x1x256xf32>
    %26 = arith.mulf %25, %25 : vector<1x1x256xf32>
    %cst_13 = arith.constant 0.000000e+00 : f32
    %27 = vector.broadcast %cst_13 : f32 to vector<1x1x256xf32>
    %28 = arith.subf %27, %26 : vector<1x1x256xf32>
    %29 = arith.mulf %28, %23 : vector<1x1x256xf32>
    %c0_14 = arith.constant 0 : index
    %c0_15 = arith.constant 0 : index
    %c0_16 = arith.constant 0 : index
    %30 = vector.load %arg6[%c0_14, %c0_15, %c0_16] : memref<1x1x256xf32, #tpu.memory_space<vmem>>, vector<1x1x256xf32>
    %31 = arith.addf %30, %29 : vector<1x1x256xf32>
    %c0_17 = arith.constant 0 : index
    %c0_18 = arith.constant 0 : index
    %c0_19 = arith.constant 0 : index
    %32 = vector.load %arg6[%c0_17, %c0_18, %c0_19] : memref<1x1x256xf32, #tpu.memory_space<vmem>>, vector<1x1x256xf32>
    tpu.vector_store %arg6[%c0_17, %c0_18, %c0_19], %31 {strides = array<i32>} : memref<1x1x256xf32, #tpu.memory_space<vmem>>, vector<1x1x256xf32>,
    %c0_i32_20 = arith.constant 0 : i32
    %33 = arith.cmpi eq, %arg1, %c0_i32_20 : i32
    %34 = arith.extui %33 : i1 to i32
    %c0_i32_21 = arith.constant 0 : i32
    %35 = arith.cmpi ne, %34, %c0_i32_21 : i32
    scf.if %35 {
      %c0_22 = arith.constant 0 : index
      %c0_23 = arith.constant 0 : index
      %c0_24 = arith.constant 0 : index
      %36 = vector.load %arg6[%c0_22, %c0_23, %c0_24] : memref<1x1x256xf32, #tpu.memory_space<vmem>>, vector<1x1x256xf32>
      %37 = vector.shape_cast %36 : vector<1x1x256xf32> to vector<1x1x1x256xf32>
      %cst_25 = arith.constant dense<0.000000e+00> : vector<1xf32>
      %38 = vector.multi_reduction <add>, %37, %cst_25 [1, 2, 3] : vector<1x1x1x256xf32> to vector<1xf32>
      %39 = vector.shape_cast %38 : vector<1xf32> to vector<1x1x1x1xf32>
      %40 = vector.extract %39[0, 0, 0, 0] : f32 from vector<1x1x1x1xf32>
      %41 = vector.broadcast %40 : f32 to vector<1x1x1xf32>
      %c0_26 = arith.constant 0 : index
      %c0_27 = arith.constant 0 : index
      %c0_28 = arith.constant 0 : index
      %42 = vector.load %arg5[%c0_26, %c0_27, %c0_28] : memref<1x1x1xf32, #tpu.memory_space<vmem>>, vector<1x1x1xf32>
      tpu.vector_store %arg5[%c0_26, %c0_27, %c0_28], %41 {strides = array<i32>} : memref<1x1x1xf32, #tpu.memory_space<vmem>>, vector<1x1x1xf32>,
    } else {
    }
    return
  }
  func.func @transform_0(%arg0: i32, %arg1: i32) -> (i32, i32, i32) {
    %c0_i32 = arith.constant 0 : i32
    %c0_i32_0 = arith.constant 0 : i32
    return %arg0, %c0_i32, %arg1 : i32, i32, i32
  }
  func.func @transform_1(%arg0: i32, %arg1: i32) -> (i32, i32, i32) {
    %c0_i32 = arith.constant 0 : i32
    %c0_i32_0 = arith.constant 0 : i32
    return %arg0, %c0_i32, %arg1 : i32, i32, i32
  }
  func.func @transform_2(%arg0: i32, %arg1: i32) -> (i32, i32, i32) {
    %c0_i32 = arith.constant 0 : i32
    %c0_i32_0 = arith.constant 0 : i32
    return %arg0, %c0_i32, %arg1 : i32, i32, i32
  }
  func.func @transform_3(%arg0: i32, %arg1: i32) -> (i32, i32, i32) {
    %c0_i32 = arith.constant 0 : i32
    %c0_i32_0 = arith.constant 0 : i32
    %c0_i32_1 = arith.constant 0 : i32
    return %arg0, %c0_i32, %c0_i32_0 : i32, i32, i32
  }
}

</mosaic_0001>

<bundles_post_ra>
// kernel: tpu_custom_call.1
= control target key start
LH: loop header
LB: loop body
LE: loop exit
PB: predicated region body
PF: predicated region fallthrough
CT: control target
= control target key end

     0   :  { %8 = vsyncpa [#allocation4], 0  ;;  %s966_s0 = inlined_call_operand.hbm [shape: f32[2,4,256], index: 0, kind: input, shape index: {}]   ;;  %s967_s1 = inlined_call_operand.hbm [shape: s32[2,1,256], index: 1, kind: input, shape index: {}]   ;;  %s968_s2 = inlined_call_operand.hbm [shape: f32[2,1,256], index: 2, kind: input, shape index: {}]   ;;  %s969_s3 = inlined_call_operand.vmem [shape: f32[2,1,1], index: 3, kind: output, shape index: {}]  }
   0x1   :  { %10 = vsyncpa [#allocation4 + $0x1], 0 }
   0x2   :  { %11 = vsyncpa [#allocation6], 0 }
   0x3   :  { %13 = vsyncpa [#allocation6 + $0x1], 0  ;;  %s820_s12 = smov 0   ;;  %s822_s13 = smov 0  }
   0x4   :  { %s824_s14 = smov 0   ;;  %s826_s15 = smov 0  }
   0x5   :  { %s828_s16 = smov 0   ;;  %s830_s17 = smov 0  }
   0x6 LB: > { %s557_s18 = sadd.s32 4294967295, %s797_s17   ;;  %s31_s19 = sadd.s32 1, %s793_s16  ;;  %s797_s17 = sphi %s830_s17, %s19_s17   ;;  %s793_s16 = sphi %s828_s16, %s979_s16   ;;  %s789_s15 = sphi %s826_s15, %s978_s15   ;;  %s785_s14 = sphi %s824_s14, %s977_s14   ;;  %s781_s13 = sphi %s822_s13, %s976_s13   ;;  %s777_s12 = sphi %s820_s12, %s975_s12  }
   0x7   : > { %p33_p0 = scmp.ge.s32.totalorder %s31_s19, 2  ;;  %s40_s20 = sadd.s32 1, %s785_s14 }
   0x8   : > { %p47_p1 = scmp.ne.s32.totalorder %s785_s14, %s781_s13  ;;  %p48_p2 = scmp.eq.s32.totalorder %s797_s17, 0 }
   0x9   : > { %s981_s19 = smov (%p33_p0, %s31_s19), 0  ;;  %p53_p4 = scmp.ne.s32.totalorder %s781_s13, %s777_s12 }
   0xa   : > { %p49_p3 = por %p48_p2, %p47_p1  ;;  %s35_s21 = ssub.s32 %s793_s16, %s981_s19 }
   0xb   : > { %p54_p5 = scmp.eq.s32.totalorder %s557_s18, 0  ;;  %p38_p6 = scmp.eq.s32.totalorder %s35_s21, 0 }
   0xc   : > { %p593_p8 = scmp.lt.s32.totalorder %s797_s17, 2  ;;  %s870_s24 = sand.u32 1, %s785_s14  }
   0xd   : > { %p861_p7 = por %p54_p5, %p53_p4  ;;  %s181_s26 = sand.u32 1, %s797_s17  }
   0xe   : > { %s867_s23 = scalar_select %p38_p6, %s785_s14, %s40_s20  }
   0xf   : > { %p872_p9 = pnand %p593_p8, %p49_p3  ;;  %s564_s27 = sshll.u32 %s870_s24, 1 }
  0x10   : > { %s565_s28 = sshll.u32 %s793_s16, 1  ;;  %s185_s5 = scalar_lea.vmem [#allocation5], %s564_s27 }
  0x11   : > { %s191_s4 = scalar_lea.hbm %s967_s1, %s565_s28  ;;  %s195_s6 = sshll.u32 %s185_s5, 4  ;;  %s196_s6 = int_to_ptr.vmem [resolvable:$true] %s195_s6 }
  0x12   : > { %s193_s7 = sshll.u32 %s191_s4, 4  ;;  %s182_s8 = scalar_lea.sflag [#allocation6], %s181_s26  ;;  %s194_s7 = int_to_ptr.hbm [resolvable:$true] %s193_s7 }
  0x13   : > { %589 = dma.hbm_to_vmem [thread:$0]  (!%p872_p9), %s194_s7, 32, %s196_s6, %s182_s8  }
  0x14   : > { %s212_s11 = scalar_lea.hbm %s968_s2, %s565_s28  ;;  %p568_p10 = scmp.ge.s32.totalorder %s797_s17, 1 }
  0x15   : > { %p221_p11 = scmp.lt.s32.totalorder %s797_s17, 3  ;;  %s561_s20 = sshll.u32 %s870_s24, 3 }
  0x16   : > { %s574_s21 = sshll.u32 %s793_s16, 3  ;;  %s163_s4 = scalar_lea.vmem [#allocation3], %s561_s20 }
  0x17   : > { %p889_p12 = pnand %p568_p10, %p221_p11  ;;  %s170_s26 = scalar_lea.hbm %s966_s0, %s574_s21 }
  0x18   : > { %s174_s5 = sshll.u32 %s163_s4, 4  ;;  %s172_s6 = sshll.u32 %s170_s26, 4  ;;  %s175_s5 = int_to_ptr.vmem [resolvable:$true] %s174_s5  ;;  %s173_s6 = int_to_ptr.hbm [resolvable:$true] %s172_s6 }
  0x19   : > { %s214_s7 = sshll.u32 %s212_s11, 4  ;;  %s160_s28 = scalar_lea.sflag [#allocation4], %s870_s24  ;;  %s215_s7 = int_to_ptr.hbm [resolvable:$true] %s214_s7 }
  0x1a   : > { %586 = dma.hbm_to_vmem [thread:$0]  (!%p872_p9), %s173_s6, 128, %s175_s5, %s160_s28  }
  0x1b   : > { %s206_s9 = scalar_lea.vmem [#allocation7], %s564_s27  ;;  %225 = sbr.rel (%p889_p12) target bundleno = 320 (0x140), region = 32 }
  0x1c   : > { %s216_s10 = sshll.u32 %s206_s9, 4  ;;  %s906_s20 = sand.u32 (!%p889_p12), 1, %s781_s13   ;;  %s217_s10 = int_to_ptr.vmem [resolvable:$true] %s216_s10 }
  0x1d   : > { %592 = dma.hbm_to_vmem [thread:$0]  (!%p872_p9), %s215_s7, 32, %s217_s10, %s182_s8  }
  0x1e   : > { %s569_s21 = sshll.u32 (!%p889_p12), %s906_s20, 3  ;;  %s228_s11 = scalar_lea.sflag (!%p889_p12), [#allocation4], %s906_s20 }
  0x1f   : > { %s231_s24 = scalar_lea.vmem (!%p889_p12), [#allocation3], %s569_s21 }
  0x20   : > { %768 = dma.done.wait (%p861_p7), %s228_s11, 128  }
  0x21   : > { %770 = vsyncadd (%p861_p7), %s228_s11, 4294967168  ;;  %s237_s25 = sand.u32 1, %s557_s18   ;;  %s570_s27 = sshll.u32 %s906_s20, 1 }
  0x22   : > { %s238_s8 = scalar_lea.sflag [#allocation6], %s237_s25  ;;  %s919_s12 = scalar_lea.vmem [#allocation5], %s570_s27 }
  0x23   : > { %772 = dma.done.wait (%p861_p7), %s238_s8, 64  }
  0x24   : > { %774 = vsyncadd (%p861_p7), %s238_s8, 4294967232  ;;  %v293_v0 = vlaneseq  ;;  %v799_v2 = vmov 0.0   ;;  %v298_v3 = vld [vmem:[%s231_s24] sm:$0xff]  ;;  %vm305_vm1 = vcmask 1043456   ;;  %v352_v25 = vld [vmem:[%s919_s12] sm:$0x3] }
  0x25   : > { %300 = vst [vmem:[#allocation1] ss:$2 sm:$0xff] %v298_v3  ;;  %v355_v33 = vperm.slane %v352_v25, 0  ;;  %v356_v34 = vperm.slane %v352_v25, 1  ;;  %s251_s18 = scalar_lea.vmem [#allocation7], %s570_s27  ;;  %vm407_vm4 = vcmask 1040384  }
  0x26   : > { %vm925_vm0 = vcmp.lt.s32.totalorder %v293_v0, 256  ;;  %v354_v30 = vshrl.u32 %v293_v0, 7  ;;  %p286_p13 = scmp.lt.s32.totalorder %s789_s15, 1  ;;  %vm438_vm5 = vcmask 0  }
  0x27   : > { %297 = vst.msk [vmem:[#allocation2] sm:$0x3] %vm925_vm0, %v799_v2 }
  0x28   : > { %vm357_vm2 = vcmp.eq.s32.totalorder %v354_v30, %v355_v33  ;;  %vm358_vm3 = vcmp.eq.s32.totalorder %v354_v30, %v356_v34  ;;  %s983_s15 = smov (!%p286_p13, %s789_s15), 1 }
  0x29   : > { %s288_s30 = scalar_lea.vmem %s969_s3, %s983_s15 }
  0x2c   : > { %v301_v4 = vld.sshfl [vmem:[#allocation1] sm:$0xff pattern:$0x75316420]  ;;  %v302_v5 = vld.sshfl [vmem:[#allocation1 + $0x8] sm:$0xff pattern:$0x75316420] }
  0x2d   : > { %v306_v6 = vsel %vm305_vm1, %v301_v4, -inf  ;;  %v313_v7 = vsel %vm305_vm1, %v302_v5, -inf }
  0x2e   : > { %v307_v8 = vrot.slane %v306_v6, 4  ;;  %v314_v9 = vrot.slane %v313_v7, 4 }
  0x30   : > { %v308_v10 = vmax.f32 %v306_v6, %v307_v8  ;;  %v315_v11 = vmax.f32 %v313_v7, %v314_v9  ;;  %v387_v8 = vld [vmem:[%s251_s18] sm:$0x3] }
  0x32   : > { %v309_v12 = vrot.slane %v308_v10, 2  ;;  %v316_v13 = vrot.slane %v315_v11, 2 }
  0x34   : > { %v310_v14 = vmax.f32 %v308_v10, %v309_v12  ;;  %v317_v15 = vmax.f32 %v315_v11, %v316_v13  ;;  %v389_v10 = vperm.slane %v387_v8, 0  ;;  %v390_v11 = vperm.slane %v387_v8, 1 }
  0x36   : > { %v311_v16 = vrot.slane %v310_v14, 1  ;;  %v318_v17 = vrot.slane %v317_v15, 1 }
  0x38   : > { %v312_v18 = vmax.f32 %v310_v14, %v311_v16  ;;  %v319_v19 = vmax.f32 %v317_v15, %v318_v17 }
  0x3a   : > { %v322_v20 = vrot.slane %v319_v19, 4 }
  0x3c   : > { %v323_v21 = vsel %vm305_vm1, %v312_v18, %v322_v20 }
  0x3d   : > { %v325_v22 = vsub.f32 %v298_v3, %v323_v21 }
  0x3f   : > { %v326_v23 = vmul.f32 1.442695, %v325_v22 }
  0x41   : > { %643 = vpow2.f32 %v326_v23  ;;  %v403_v23 = vld [vmem:[#allocation2] sm:$0x3] }
  0x47   : > { %v644_v24 = vpop.eup %643 }
  0x48   : > { %329 = vst [vmem:[#allocation1] ss:$2 sm:$0xff] %v644_v24 }
  0x4f   : > { %v330_v26 = vld.sshfl [vmem:[#allocation1] sm:$0xff pattern:$0x75316420]  ;;  %v331_v27 = vld.sshfl [vmem:[#allocation1 + $0x8] sm:$0xff pattern:$0x75316420] }
  0x50   : > { %v334_v28 = vsel %vm305_vm1, %v330_v26, 0.0  ;;  %v341_v29 = vsel %vm305_vm1, %v331_v27, 0.0  ;;  %360 = vst [vmem:[#allocation1] ss:$2 sm:$0xff] %v325_v22 }
  0x51   : > { %v335_v31 = vrot.slane %v334_v28, 4  ;;  %v342_v32 = vrot.slane %v341_v29, 4 }
  0x53   : > { %v336_v35 = vadd.f32 %v335_v31, %v334_v28  ;;  %v343_v36 = vadd.f32 %v342_v32, %v341_v29 }
  0x55   : > { %v337_v37 = vrot.slane %v336_v35, 2  ;;  %v344_v38 = vrot.slane %v343_v36, 2 }
  0x57   : > { %v338_v39 = vadd.f32 %v337_v37, %v336_v35  ;;  %v345_v40 = vadd.f32 %v344_v38, %v343_v36  ;;  %v361_v41 = vld.sshfl [vmem:[#allocation1] sm:$0xff pattern:$0x75316420]  ;;  %v362_v42 = vld.sshfl [vmem:[#allocation1 + $0x8] sm:$0xff pattern:$0x75316420] }
  0x58   : > { %v365_v43 = vsel %vm357_vm2, %v361_v41, 0.0  ;;  %v366_v44 = vsel %vm358_vm3, %v362_v42, 0.0 }
  0x59   : > { %v339_v45 = vrot.slane %v338_v39, 1  ;;  %v346_v46 = vrot.slane %v345_v40, 1  ;;  %v367_v47 = vsel %vm305_vm1, %v365_v43, 0.0  ;;  %v374_v48 = vsel %vm305_vm1, %v366_v44, 0.0 }
  0x5a   : > { %v368_v49 = vrot.slane %v367_v47, 4  ;;  %v375_v50 = vrot.slane %v374_v48, 4 }
  0x5b   : > { %v340_v51 = vadd.f32 %v339_v45, %v338_v39  ;;  %v347_v52 = vadd.f32 %v346_v46, %v345_v40 }
  0x5c   : > { %v369_v53 = vadd.f32 %v368_v49, %v367_v47  ;;  %v376_v54 = vadd.f32 %v375_v50, %v374_v48 }
  0x5d   : > { %645 = vlog2.f32 %v340_v51 }
  0x5e   : > { %647 = vlog2.f32 %v347_v52  ;;  %v370_v55 = vrot.slane %v369_v53, 2  ;;  %v377_v56 = vrot.slane %v376_v54, 2 }
  0x60   : > { %v371_v57 = vadd.f32 %v370_v55, %v369_v53  ;;  %v378_v58 = vadd.f32 %v377_v56, %v376_v54 }
  0x62   : > { %v372_v59 = vrot.slane %v371_v57, 1  ;;  %v379_v60 = vrot.slane %v378_v58, 1 }
  0x63   : > { %v646_v61 = vpop.eup %645 }
  0x64   : > { %v648_v62 = vpop.eup %647  ;;  %v349_v63 = vmul.f32 0.6931472, %v646_v61  ;;  %v373_v0 = vadd.f32 %v372_v59, %v371_v57  ;;  %v380_v2 = vadd.f32 %v379_v60, %v378_v58 }
  0x65   : > { %v351_v3 = vmul.f32 0.6931472, %v648_v62 }
  0x66   : > { %v381_v4 = vsub.f32 %v373_v0, %v349_v63 }
  0x67   : > { %v382_v5 = vsub.f32 %v380_v2, %v351_v3 }
  0x68   : > { %v383_v6 = vmul.f32 1.442695, %v381_v4  ;;  %v393_v16 = vmul.f32 %v389_v10, %v381_v4 }
  0x69   : > { %v385_v7 = vmul.f32 1.442695, %v382_v5  ;;  %v394_v17 = vmul.f32 %v390_v11, %v382_v5 }
  0x6a   : > { %649 = vpow2.f32 %v383_v6 }
  0x6b   : > { %651 = vpow2.f32 %v385_v7 }
  0x70   : > { %v650_v9 = vpop.eup %649 }
  0x71   : > { %v652_v12 = vpop.eup %651  ;;  %v395_v13 = vsub.f32 1.0, %v650_v9 }
  0x72   : > { %v396_v14 = vsub.f32 1.0, %v652_v12 }
  0x73   : > { %v397_v15 = vmul.f32 %v395_v13, %v395_v13 }
  0x74   : > { %v398_v18 = vmul.f32 %v396_v14, %v396_v14 }
  0x75   : > { %v399_v19 = vsub.f32 0.0, %v397_v15 }
  0x76   : > { %v400_v20 = vsub.f32 0.0, %v398_v18 }
  0x77   : > { %v401_v21 = vmul.f32 %v399_v19, %v393_v16 }
  0x78   : > { %v402_v22 = vmul.f32 %v400_v20, %v394_v17 }
  0x7a   : > { %v406_v24 = vrot.slane %v402_v22, 7 }
  0x7c   : > { %v408_v25 = vsel %vm407_vm4, %v401_v21, %v406_v24 }
  0x7d   : > { %v410_v26 = vadd.f32 %v408_v25, %v403_v23 }
  0x7f   : > { %415 = vst.msk [vmem:[#allocation2] sm:$0x3] %vm925_vm0, %v410_v26 }
  0x86   : > { %v419_v27 = vld [vmem:[#allocation2] sm:$0x3] }
  0x87   : > { %v421_v28 = vperm.slane %v419_v27, 0  ;;  %v422_v29 = vperm.slane %v419_v27, 1 }
  0x89   : > { %v425_v30 = vsel %vm407_vm4, %v421_v28, 0.0  ;;  %v426_v31 = vsel %vm407_vm4, %v422_v29, 0.0 }
  0x8a   : > { %v427_v32 = vadd.f32 %v426_v31, %v425_v30 }
  0x8c   : > { %428 = vadd.xlane.f32.xlu0 %v427_v32 }
  0xff   : > { %v429_v33 = vpop.xlane.xlu0 %428 }
 0x100   : > { %v430_v34 = vrot.slane %v429_v33, 4 }
 0x102   : > { %v431_v35 = vadd.f32 %v430_v34, %v429_v33 }
 0x104   : > { %v432_v36 = vrot.slane %v431_v35, 2 }
 0x106   : > { %v433_v37 = vadd.f32 %v432_v36, %v431_v35 }
 0x108   : > { %v434_v38 = vrot.slane %v433_v37, 1 }
 0x10a   : > { %v435_v39 = vadd.f32 %v434_v38, %v433_v37 }
 0x10c   : > { %575 = vpush %v435_v39 }
 0x13d   : > { %s576_s26 = spop %575 }
 0x13e   : > { %v437_v1 = vstv %s576_s26 }
 0x13f   : > { %439 = vst.msk [vmem:[%s288_s30] sm:$0x1] %vm438_vm5, %v437_v1 }
 0x140 PF: > { %s19_s17 = sadd.s32 1, %s797_s17   ;;  %s975_s12 = smov %s781_s13 }
 0x141   : > { %p16_p0 = scmp.ge.s32.totalorder %s19_s17, 4   ;;  %s976_s13 = smov %s785_s14 }
 0x142   : > { %s977_s14 = smov %s867_s23  ;;  %s978_s15 = smov %s793_s16 }
 0x143   : > { %s979_s16 = smov %s981_s19  ;;  %18 = sbr.rel (!%p16_p0) target bundleno = 6 (0x6), region = 104 }
 0x148   :  { %457 = vsyncpa [#allocation4], 1 }
 0x149   :  { %459 = vsyncpa [#allocation4 + $0x1], 1 }
 0x14a   :  { %460 = vsyncpa [#allocation6], 1 }
 0x14b   :  { %462 = vsyncpa [#allocation6 + $0x1], 1 }

</bundles_post_ra>
